<compile_context>
chip_gen: v6e
topology: v6e:2x2x1
jax: 0.10.0
libtpu: 0.0.40
codegen_flags: <defaults>
</compile_context>

<pallas_src>
import math
import jax
import jax.numpy as jnp
from jax.experimental import pallas as pl
from jax.experimental.pallas import tpu as pltpu


def _data_embedding_kernel(x_ref, halo_ref, w_ref, pp_ref, o_ref):
    # x_ref   : (TL, C)       one L-tile of one batch element (compute dtype)
    # halo_ref: (2, C)        [x[(t0-1) mod L], x[(t0+TL) mod L]] for this tile
    # w_ref   : (3, C, Dp)    conv taps k=0,1,2 (compute dtype), D padded to 128
    # pp_ref  : (2, Dp)       f32 [freq; phase] so that pe[t, d] = sin(t*freq[d] + phase[d])
    # o_ref   : (TL, Dp)      output tile
    tl = x_ref.shape[0]
    row = jax.lax.broadcasted_iota(jnp.int32, (tl, 1), 0)

    x = x_ref[...]
    xf = x.astype(jnp.float32)

    # Circularly-shifted views built in VMEM: sublane roll (XLU) + single-row halo fix-up.
    x_prev = pltpu.roll(xf, shift=1, axis=0)
    x_prev = jnp.where(row == 0, halo_ref[0:1, :].astype(jnp.float32), x_prev)
    x_next = pltpu.roll(xf, shift=tl - 1, axis=0)
    x_next = jnp.where(row == tl - 1, halo_ref[1:2, :].astype(jnp.float32), x_next)

    cdt = x.dtype
    acc = jnp.dot(x, w_ref[1], preferred_element_type=jnp.float32)
    acc = acc + jnp.dot(x_prev.astype(cdt), w_ref[0], preferred_element_type=jnp.float32)
    acc = acc + jnp.dot(x_next.astype(cdt), w_ref[2], preferred_element_type=jnp.float32)

    # Positional embedding generated in-kernel (EUP sin) -> no HBM stream for PE.
    t0 = pl.program_id(1) * tl
    pos = (row + t0).astype(jnp.float32)                       # (TL, 1)
    pe = jnp.sin(pos * pp_ref[0:1, :] + pp_ref[1:2, :])        # (TL, Dp)

    o_ref[...] = (acc + pe).astype(o_ref.dtype)


def _choose_tile_l(L, target=512):
    """Largest multiple of 8 that divides L and is <= target; else full L."""
    if L <= target:
        return L
    if L % 8 != 0:
        return L
    tl = (target // 8) * 8
    while tl >= 8:
        if L % tl == 0:
            return tl
        tl -= 8
    return L


def make_positional_embedding(seq_len, model_dim):
    pos = jnp.arange(seq_len, dtype=jnp.float32)[:, None]
    div_term = jnp.exp(
        jnp.arange(0, model_dim, 2, dtype=jnp.float32)
        * (-(math.log(10000.0) / model_dim))
    )
    pe = jnp.zeros((seq_len, model_dim), dtype=jnp.float32)
    pe = pe.at[:, 0::2].set(jnp.sin(pos * div_term))
    pe = pe.at[:, 1::2].set(jnp.cos(pos * div_term))
    return pe


def data_embedding(x, conv_weight, *, tile_l=None, compute_dtype=None):
    """x: (B, L, C) float32; conv_weight: (D, C, 3) float32 (PyTorch Conv1d layout).

    compute_dtype: dtype fed to the MXU (e.g. jnp.bfloat16 on v6e/v7x). Accumulation,
    PE and the final add stay in float32; output dtype matches x.
    """
    B, L, C = x.shape
    D = conv_weight.shape[0]
    assert conv_weight.shape == (D, C, 3)
    out_dtype = x.dtype
    if compute_dtype is None:
        compute_dtype = x.dtype

    # Lane-dense output: pad D up to a multiple of 128, slice after.
    D_pad = max(128, ((D + 127) // 128) * 128)

    TL = _choose_tile_l(L) if tile_l is None else tile_l
    assert L % TL == 0, "tile_l must divide L"
    NL = L // TL

    # Weights: (3, C, D_pad) with w[k, c, d] = conv_weight[d, c, k]  (circular conv taps).
    w = jnp.transpose(conv_weight, (2, 1, 0))                       # (3, C, D)
    if D_pad != D:
        w = jnp.pad(w, ((0, 0), (0, 0), (0, D_pad - D)))
    w = w.astype(compute_dtype)

    xc = x.astype(compute_dtype)

    # Tiny per-tile halo rows (2 rows per (batch, tile)) instead of 3x-duplicated x in HBM.
    starts = jnp.arange(NL) * TL
    prev_idx = (starts - 1) % L
    next_idx = (starts + TL) % L
    halo = jnp.stack([xc[:, prev_idx, :], xc[:, next_idx, :]], axis=2)   # (B, NL, 2, C)

    # PE params: pe[t, d] = sin(t * freq[d] + phase[d]); cos(x) = sin(x + pi/2).
    # TODO(synk): assumes even model_dim (the PyTorch module's interleaving requires it too).
    d_idx = jnp.arange(D_pad)
    freq = jnp.exp(-(2.0 * (d_idx // 2)).astype(jnp.float32) * (math.log(10000.0) / D))
    freq = jnp.where(d_idx < D, freq, 0.0)
    phase = jnp.where((d_idx % 2 == 1) & (d_idx < D), math.pi / 2, 0.0).astype(jnp.float32)
    pe_params = jnp.stack([freq, phase], axis=0)                    # (2, D_pad)

    # Explicit VMEM budget (double-buffered tiles + resident weights), capped for v7x's 64 MiB.
    cb = jnp.dtype(compute_dtype).itemsize
    ob = jnp.dtype(out_dtype).itemsize
    est = (2 * TL * C * cb            # x tiles (double-buffered)
           + 2 * 2 * C * cb           # halos
           + 3 * C * D_pad * cb       # resident weights
           + 2 * D_pad * 4            # pe params
           + 2 * TL * D_pad * ob      # output tiles (double-buffered)
           + TL * D_pad * 4)          # accumulator headroom
    vmem_limit = int(min(max(4 * est, 8 << 20), 64 << 20))

    out = pl.pallas_call(
        _data_embedding_kernel,
        out_shape=jax.ShapeDtypeStruct((B, L, D_pad), out_dtype),
        grid_spec=pltpu.PrefetchScalarGridSpec(
            num_scalar_prefetch=0,
            grid=(B, NL),
            in_specs=[
                pl.BlockSpec((None, TL, C), lambda b, l: (b, l, 0)),
                pl.BlockSpec((None, None, 2, C), lambda b, l: (b, l, 0, 0)),
                pl.BlockSpec((3, C, D_pad), lambda b, l: (0, 0, 0)),
                pl.BlockSpec((2, D_pad), lambda b, l: (0, 0)),
            ],
            out_specs=pl.BlockSpec((None, TL, D_pad), lambda b, l: (b, l, 0)),
        ),
        compiler_params=pltpu.CompilerParams(
            dimension_semantics=("parallel", "parallel"),
            vmem_limit_bytes=vmem_limit,
        ),
    )(xc, halo, w, pe_params)

    if D_pad != D:
        out = out[:, :, :D]
    return out


def data_embedding_ref(x, conv_weight):
    """Pure-JAX reference (circular Conv1d k=3 pad=1, bias=False, + positional embedding)."""
    B, L, C = x.shape
    D = conv_weight.shape[0]
    x_m1 = jnp.roll(x, 1, axis=1)
    x_p1 = jnp.roll(x, -1, axis=1)
    out = (
        jnp.einsum("blc,dc->bld", x_m1, conv_weight[:, :, 0])
        + jnp.einsum("blc,dc->bld", x, conv_weight[:, :, 1])
        + jnp.einsum("blc,dc->bld", x_p1, conv_weight[:, :, 2])
    )
    return out + make_positional_embedding(L, D)[None]


if __name__ == "__main__":
    B, L, C_in, D = 2, 8, 4, 32

    key = jax.random.PRNGKey(0)
    kx, kw = jax.random.split(key)

    x = jax.random.normal(kx, (B, L, C_in), dtype=jnp.float32)

    # Conv1d weight (D, C_in, 3), Kaiming-normal fan_in / leaky_relu(0.01) init (bias=False).
    fan_in = C_in * 3
    gain = math.sqrt(2.0 / (1.0 + 0.01 ** 2))
    std = gain / math.sqrt(fan_in)
    conv_weight = std * jax.random.normal(kw, (D, C_in, 3), dtype=jnp.float32)

    ref = data_embedding_ref(x, conv_weight)

    # f32 path (exact check).
    out = jax.block_until_ready(data_embedding(x, conv_weight))
    assert out.shape == (B, L, D)
    assert jnp.allclose(out, ref, atol=1e-5, rtol=1e-5), float(jnp.max(jnp.abs(out - ref)))

    # bf16 MXU-input path (v6e/v7x HBM-bytes win); f32 accumulate/PE, looser tolerance.
    out_bf16 = jax.block_until_ready(
        data_embedding(x, conv_weight, compute_dtype=jnp.bfloat16)
    )
    assert out_bf16.shape == (B, L, D)
    assert jnp.allclose(out_bf16, ref, atol=5e-2, rtol=5e-2)

    print("KERNEL_OK")
</pallas_src>

<mosaic_0001>
module attributes {stable_mosaic.version = 11 : i64} {
  func.func @_data_embedding_kernel(%arg0: i32, %arg1: i32, %arg2: memref<1x8x4xf32, #tpu.memory_space<vmem>>, %arg3: memref<1x1x2x4xf32, #tpu.memory_space<vmem>>, %arg4: memref<3x4x128xf32, #tpu.memory_space<vmem>>, %arg5: memref<2x128xf32, #tpu.memory_space<vmem>>, %arg6: memref<1x8x128xf32, #tpu.memory_space<vmem>>) attributes {dimension_semantics = [#tpu.dimension_semantics<parallel>, #tpu.dimension_semantics<parallel>], iteration_bounds = array<i64: 2, 1>, scalar_prefetch = 0 : i64, scratch_operands = 0 : i64, tpu.core_type = #tpu.core_type<tc>, window_params = [{transform_indices = @transform_0, window_bounds = array<i64: 1, 8, 4>}, {transform_indices = @transform_1, window_bounds = array<i64: 1, 1, 2, 4>}, {pipeline_mode = #tpu.pipeline_mode<synchronous>, transform_indices = @transform_2, window_bounds = array<i64: 3, 4, 128>}, {pipeline_mode = #tpu.pipeline_mode<synchronous>, transform_indices = @transform_3, window_bounds = array<i64: 2, 128>}, {transform_indices = @transform_4, window_bounds = array<i64: 1, 8, 128>}]} {
    %0 = tpu.iota {dimensions = array<i32: 0>} : vector<8x1xi32>
    %c0 = arith.constant 0 : index
    %c0_0 = arith.constant 0 : index
    %c0_1 = arith.constant 0 : index
    %1 = vector.load %arg2[%c0, %c0_0, %c0_1] : memref<1x8x4xf32, #tpu.memory_space<vmem>>, vector<1x8x4xf32>
    %2 = vector.shape_cast %1 : vector<1x8x4xf32> to vector<8x4xf32>
    %c1_i32 = arith.constant 1 : i32
    %3 = tpu.dynamic_rotate %2 by %c1_i32 dim 0 : vector<8x4xf32>, i32 -> vector<8x4xf32>
    %c0_i32 = arith.constant 0 : i32
    %4 = vector.broadcast %c0_i32 : i32 to vector<8x1xi32>
    %5 = arith.cmpi eq, %0, %4 : vector<8x1xi32>
    %c0_2 = arith.constant 0 : index
    %c0_3 = arith.constant 0 : index
    %c0_4 = arith.constant 0 : index
    %c0_5 = arith.constant 0 : index
    %6 = vector.load %arg3[%c0_2, %c0_3, %c0_4, %c0_5] : memref<1x1x2x4xf32, #tpu.memory_space<vmem>>, vector<1x1x1x4xf32>
    %7 = vector.shape_cast %6 : vector<1x1x1x4xf32> to vector<1x4xf32>
    %8 = vector.shape_cast %5 : vector<8x1xi1> to vector<8x1xi1>
    %9 = vector.broadcast %8 : vector<8x1xi1> to vector<8x4xi1>
    %10 = vector.shape_cast %7 : vector<1x4xf32> to vector<1x4xf32>
    %11 = vector.broadcast %10 : vector<1x4xf32> to vector<8x4xf32>
    %12 = arith.select %9, %11, %3 : vector<8x4xi1>, vector<8x4xf32>
    %c7_i32 = arith.constant 7 : i32
    %13 = tpu.dynamic_rotate %2 by %c7_i32 dim 0 : vector<8x4xf32>, i32 -> vector<8x4xf32>
    %c7_i32_6 = arith.constant 7 : i32
    %14 = vector.broadcast %c7_i32_6 : i32 to vector<8x1xi32>
    %15 = arith.cmpi eq, %0, %14 : vector<8x1xi32>
    %c0_7 = arith.constant 0 : index
    %c0_8 = arith.constant 0 : index
    %c1 = arith.constant 1 : index
    %c0_9 = arith.constant 0 : index
    %16 = vector.load %arg3[%c0_7, %c0_8, %c1, %c0_9] : memref<1x1x2x4xf32, #tpu.memory_space<vmem>>, vector<1x1x1x4xf32>
    %17 = vector.shape_cast %16 : vector<1x1x1x4xf32> to vector<1x4xf32>
    %18 = vector.shape_cast %15 : vector<8x1xi1> to vector<8x1xi1>
    %19 = vector.broadcast %18 : vector<8x1xi1> to vector<8x4xi1>
    %20 = vector.shape_cast %17 : vector<1x4xf32> to vector<1x4xf32>
    %21 = vector.broadcast %20 : vector<1x4xf32> to vector<8x4xf32>
    %22 = arith.select %19, %21, %13 : vector<8x4xi1>, vector<8x4xf32>
    %c1_10 = arith.constant 1 : index
    %c0_11 = arith.constant 0 : index
    %c0_12 = arith.constant 0 : index
    %23 = vector.load %arg4[%c1_10, %c0_11, %c0_12] : memref<3x4x128xf32, #tpu.memory_space<vmem>>, vector<1x4x128xf32>
    %24 = vector.shape_cast %23 : vector<1x4x128xf32> to vector<4x128xf32>
    %cst = arith.constant dense<0.000000e+00> : vector<8x128xf32>
    %25 = tpu.matmul %2, %24, %cst {dimension_numbers = #tpu.dot_dimension_numbers<[1], [0], [0], [1], [0, 0, 1, 1], [], []>} : vector<8x4xf32>, vector<4x128xf32>, vector<8x128xf32> -> vector<8x128xf32>
    %c0_13 = arith.constant 0 : index
    %c0_14 = arith.constant 0 : index
    %c0_15 = arith.constant 0 : index
    %26 = vector.load %arg4[%c0_13, %c0_14, %c0_15] : memref<3x4x128xf32, #tpu.memory_space<vmem>>, vector<1x4x128xf32>
    %27 = vector.shape_cast %26 : vector<1x4x128xf32> to vector<4x128xf32>
    %cst_16 = arith.constant dense<0.000000e+00> : vector<8x128xf32>
    %28 = tpu.matmul %12, %27, %cst_16 {dimension_numbers = #tpu.dot_dimension_numbers<[1], [0], [0], [1], [0, 0, 1, 1], [], []>} : vector<8x4xf32>, vector<4x128xf32>, vector<8x128xf32> -> vector<8x128xf32>
    %29 = arith.addf %25, %28 : vector<8x128xf32>
    %c2 = arith.constant 2 : index
    %c0_17 = arith.constant 0 : index
    %c0_18 = arith.constant 0 : index
    %30 = vector.load %arg4[%c2, %c0_17, %c0_18] : memref<3x4x128xf32, #tpu.memory_space<vmem>>, vector<1x4x128xf32>
    %31 = vector.shape_cast %30 : vector<1x4x128xf32> to vector<4x128xf32>
    %cst_19 = arith.constant dense<0.000000e+00> : vector<8x128xf32>
    %32 = tpu.matmul %22, %31, %cst_19 {dimension_numbers = #tpu.dot_dimension_numbers<[1], [0], [0], [1], [0, 0, 1, 1], [], []>} : vector<8x4xf32>, vector<4x128xf32>, vector<8x128xf32> -> vector<8x128xf32>
    %33 = arith.addf %29, %32 : vector<8x128xf32>
    %c8_i32 = arith.constant 8 : i32
    %34 = arith.muli %arg1, %c8_i32 : i32
    %35 = vector.broadcast %34 : i32 to vector<8x1xi32>
    %36 = arith.addi %0, %35 : vector<8x1xi32>
    %37 = arith.sitofp %36 : vector<8x1xi32> to vector<8x1xf32>
    %c0_20 = arith.constant 0 : index
    %c0_21 = arith.constant 0 : index
    %38 = vector.load %arg5[%c0_20, %c0_21] : memref<2x128xf32, #tpu.memory_space<vmem>>, vector<1x128xf32>
    %39 = vector.broadcast %37 : vector<8x1xf32> to vector<8x128xf32>
    %40 = vector.broadcast %38 : vector<1x128xf32> to vector<8x128xf32>
    %41 = arith.mulf %39, %40 : vector<8x128xf32>
    %c1_22 = arith.constant 1 : index
    %c0_23 = arith.constant 0 : index
    %42 = vector.load %arg5[%c1_22, %c0_23] : memref<2x128xf32, #tpu.memory_space<vmem>>, vector<1x128xf32>
    %43 = vector.broadcast %42 : vector<1x128xf32> to vector<8x128xf32>
    %44 = arith.addf %41, %43 : vector<8x128xf32>
    %45 = math.sin %44 : vector<8x128xf32>
    %46 = arith.addf %33, %45 : vector<8x128xf32>
    %c0_24 = arith.constant 0 : index
    %c0_25 = arith.constant 0 : index
    %c0_26 = arith.constant 0 : index
    %47 = vector.load %arg6[%c0_24, %c0_25, %c0_26] : memref<1x8x128xf32, #tpu.memory_space<vmem>>, vector<1x8x128xf32>
    %48 = vector.shape_cast %47 : vector<1x8x128xf32> to vector<8x128xf32>
    %49 = vector.shape_cast %46 : vector<8x128xf32> to vector<1x8x128xf32>
    tpu.vector_store %arg6[%c0_24, %c0_25, %c0_26], %49 {strides = array<i32>} : memref<1x8x128xf32, #tpu.memory_space<vmem>>, vector<1x8x128xf32>,
    return
  }
  func.func @transform_0(%arg0: i32, %arg1: i32) -> (i32, i32, i32) {
    %c0_i32 = arith.constant 0 : i32
    %c0_i32_0 = arith.constant 0 : i32
    return %arg0, %arg1, %c0_i32 : i32, i32, i32
  }
  func.func @transform_1(%arg0: i32, %arg1: i32) -> (i32, i32, i32, i32) {
    %c0_i32 = arith.constant 0 : i32
    %c0_i32_0 = arith.constant 0 : i32
    %c0_i32_1 = arith.constant 0 : i32
    return %arg0, %arg1, %c0_i32, %c0_i32_0 : i32, i32, i32, i32
  }
  func.func @transform_2(%arg0: i32, %arg1: i32) -> (i32, i32, i32) {
    %c0_i32 = arith.constant 0 : i32
    %c0_i32_0 = arith.constant 0 : i32
    %c0_i32_1 = arith.constant 0 : i32
    %c0_i32_2 = arith.constant 0 : i32
    return %c0_i32, %c0_i32_0, %c0_i32_1 : i32, i32, i32
  }
  func.func @transform_3(%arg0: i32, %arg1: i32) -> (i32, i32) {
    %c0_i32 = arith.constant 0 : i32
    %c0_i32_0 = arith.constant 0 : i32
    %c0_i32_1 = arith.constant 0 : i32
    return %c0_i32, %c0_i32_0 : i32, i32
  }
  func.func @transform_4(%arg0: i32, %arg1: i32) -> (i32, i32, i32) {
    %c0_i32 = arith.constant 0 : i32
    %c0_i32_0 = arith.constant 0 : i32
    return %arg0, %arg1, %c0_i32 : i32, i32, i32
  }
}

</mosaic_0001>

<bundles_post_ra>
// kernel: tpu_custom_call.1
= control target key start
LH: loop header
LB: loop body
LE: loop exit
PB: predicated region body
PF: predicated region fallthrough
CT: control target
= control target key end

     0   :  { %9 = vsyncpa [#allocation3], 0  ;;  %s1119_s0 = inlined_call_operand.vmem [shape: f32[2,8,4], index: 0, kind: input, shape index: {}]   ;;  %s1120_s1 = inlined_call_operand.vmem [shape: f32[2,1,2,4], index: 1, kind: input, shape index: {}]   ;;  %s1121_s2 = inlined_call_operand.vmem [shape: f32[3,4,128], index: 2, kind: input, shape index: {}]   ;;  %s1122_s3 = inlined_call_operand.vmem [shape: f32[2,128], index: 3, kind: input, shape index: {}]   ;;  %s1123_s4 = inlined_call_operand.hbm [shape: f32[2,8,128], index: 4, kind: output, shape index: {}]  }
   0x1   :  { %11 = vsyncpa [#allocation3 + $0x1], 0  ;;  %s960_s15 = smov 0   ;;  %s962_s16 = smov 0  }
   0x2   :  { %s964_s17 = smov 0   ;;  %s966_s18 = smov 0  }
   0x3   :  { %s968_s19 = smov 0   ;;  %s970_s20 = smov 0  }
   0x4 LB: > { %s728_s21 = sadd.s32 4294967295, %s924_s20   ;;  %s729_s22 = sadd.s32 4294967294, %s924_s20   ;;  %s924_s20 = sphi %s970_s20, %s17_s20   ;;  %s920_s19 = sphi %s968_s19, %s1130_s19   ;;  %s916_s18 = sphi %s966_s18, %s1129_s18   ;;  %s912_s17 = sphi %s964_s17, %s1128_s17   ;;  %s908_s16 = sphi %s962_s16, %s1127_s16   ;;  %s904_s15 = sphi %s960_s15, %s1126_s15  }
   0x5   : > { %s29_s23 = sadd.s32 1, %s920_s19  ;;  %s136_s24 = sadd.s32 1, %s912_s17 }
   0x6   : > { %p31_p0 = scmp.ge.s32.totalorder %s29_s23, 2  ;;  %p146_p1 = scmp.ne.s32.totalorder %s912_s17, %s908_s16 }
   0x7   : > { %p147_p2 = scmp.eq.s32.totalorder %s728_s21, 1  ;;  %p152_p3 = scmp.ne.s32.totalorder %s908_s16, %s904_s15 }
   0x8   : > { %s1132_s23 = smov (%p31_p0, %s29_s23), 0  ;;  %p153_p5 = scmp.eq.s32.totalorder %s729_s22, 1 }
   0x9   : > { %p1000_p4 = por %p147_p2, %p146_p1  ;;  %s131_s26 = ssub.s32 %s920_s19, %s1132_s23 }
   0xa   : > { %p732_p6 = scmp.ge.s32.totalorder %s924_s20, 1  ;;  %p134_p7 = scmp.eq.s32.totalorder %s131_s26, 0 }
   0xb   : > { %p1007_p8 = por %p153_p5, %p152_p3  ;;  %p197_p9 = scmp.lt.s32.totalorder %s924_s20, 3 }
   0xc   : > { %s1013_s28 = scalar_select %p134_p7, %s912_s17, %s136_s24  }
   0xd   : > { %p198_p10 = pnand %p732_p6, %p197_p9 }
   0xe   : > { %p232_p11 = scmp.lt.s32.totalorder (!%p198_p10), %s916_s18, 1  ;;  %s229_s6 = sand.u32 (!%p198_p10), 1, %s908_s16  }
   0xf   : > { %201 = sbr.rel (%p198_p10) target bundleno = 243 (0xf3), region = 36  ;;  %s628_s14 = scalar_lea.sflag (!%p198_p10), [#allocation3], %s229_s6 }
  0x10   : > { %s934_s22 = smov (!%p198_p10), [#allocation2]  }
  0x11   : > { %s852_s24 = sshll.u32 (!%p198_p10), %s934_s22, 4  ;;  %s853_s24 = int_to_ptr.vmem [resolvable:$false] %s852_s24 }
  0x14   : > { %v271_v0 = vld [vmem:[%s1121_s2] sm:$0xf]  ;;  %vm276_vm0 = vcmask 1043456   ;;  %v246_v1 = vlaneseq  ;;  %v926_v2 = vmov 0.0   ;;  %v738_v3 = vld [vmem:[%s1121_s2 + $0x4] sm:$0xf] }
  0x15   : > { %762 = vmatprep.subr.mxu0 %v926_v2  ;;  %767 = vmatprep.subr.mxu1 %v926_v2  ;;  %vm927_vm1 = vmmov 0   ;;  %s233_s7 = scalar_select %p232_p11, %s916_s18, 1  ;;  %vm272_vm2 = vcmask 31744   ;;  %v743_v10 = vld [vmem:[%s1121_s2 + $0x8] sm:$0xf] }
  0x16   : > { %763 = vmatpush3.msk.msra.mxu0 %vm276_vm0, %v271_v0  ;;  %764 = vmatprep.mubr.msk.f32.mxu0 %vm927_vm1, %v926_v2  ;;  %v247_v4 = vshrl.u32 %v246_v1, 7  ;;  %v746_v14 = vld [vmem:[%s1122_s3] ss:$0 sm:$0xff]  ;;  %v747_v16 = vld [vmem:[%s1122_s3 + $0x1] ss:$0 sm:$0xff] }
  0x17   : > { %768 = vmatpush3.msk.msra.mxu1 %vm276_vm0, %v738_v3  ;;  %769 = vmatprep.mubr.msk.f32.mxu1 %vm927_vm1, %v926_v2  ;;  %s734_s8 = sshll.u32 %s233_s7, 3  ;;  %s735_s9 = sshll.u32 %s233_s7, 1  ;;  %v928_v25 = vmov 2102212464   ;;  %v929_v27 = vmov 920167782  }
  0x18   : > { %772 = vmatprep.subr.mxu0 %v926_v2  ;;  %s238_s12 = scalar_lea.vmem %s1119_s0, %s734_s8  ;;  %s245_s21 = scalar_lea.vmem %s1120_s1, %s735_s9  ;;  %vm250_vm3 = vcmp.eq.s32.totalorder %v247_v4, 0  ;;  %vm260_vm4 = vcmp.eq.s32.totalorder %v247_v4, 7  ;;  %v508_v13 = vcvt.s32.f32 %v247_v4  ;;  %v930_v32 = vmov 1326507024  }
  0x19   : > { %v248_v5 = vld [vmem:[%s238_s12] sm:$0xff]  ;;  %v931_v34 = vmov 683565275   ;;  %v932_v36 = vmov 2475754826   ;;  %s733_s7 = sshll.u32 %s229_s6, 3 }
  0x1a   : > { %v736_v6 = vld [vmem:[%s245_s21] ss:$0 sm:$0xff]  ;;  %v249_v7 = vrot.slane %v248_v5, 7  ;;  %770 = vmatmul.mubr.msk.f32.vlgmr.msra.gmra.mxu1 %vm272_vm2, %v248_v5  ;;  %v259_v8 = vrot.slane %v248_v5, 1  ;;  %v737_v9 = vld [vmem:[%s245_s21 + $0x1] ss:$0 sm:$0xff]  ;;  %v514_v15 = vmul.f32 %v746_v14, %v508_v13 }
  0x1b   : > { %v933_v39 = vmov 2131351028   ;;  %s753_s8 = sshll.u32 %s916_s18, 7  ;;  %s231_s9 = scalar_lea.vmem [#allocation2], %s733_s7 }
  0x1c   : > { %v258_v11 = vsel %vm250_vm3, %v736_v6, %v249_v7  ;;  %v268_v12 = vsel %vm260_vm4, %v737_v9, %v259_v8  ;;  %v1047_v17 = vadd.f32 %v747_v16, %v514_v15  ;;  %s642_s10 = sshll.u32 %s231_s9, 4  ;;  %s640_s13 = scalar_lea.hbm %s1123_s4, %s753_s8  ;;  %s643_s10 = int_to_ptr.vmem [resolvable:$true] %s642_s10 }
  0x1d   : > { %765 = vmatmul.mubr.msk.f32.vlgmr.msra.gmra.mxu0 %vm272_vm2, %v258_v11  ;;  %s848_s21 = scalar_lea.vmem %s643_s10, 128  ;;  %s854_s18 = scalar_lea.vmem %s853_s24, 256 }
  0x1e   : > { %773 = vmatpush3.msk.msra.mxu0 %vm276_vm0, %v743_v10  ;;  %774 = vmatprep.mubr.msk.f32.mxu0 %vm927_vm1, %v926_v2  ;;  %v524_v18 = vand.u32 2139095040, %v1047_v17  ;;  %v521_v29 = vand.u32 2147483647, %v1047_v17  ;;  %vm523_vm12 = vcmp.lt.s32.totalorder %v1047_v17, 0  ;;  %vm613_vm1 = vweird.f32 %v1047_v17  ;;  %p849_p12 = scmp.ne.s32.totalorder %s643_s10, %s848_s21  ;;  %p855_p1 = scmp.lt.s32.totalorder %s643_s10, %s853_s24 }
  0x1f   : > { %p856_p2 = scmp.lt.s32.totalorder %s854_s18, %s848_s21 }
  0x20   : > { %v525_v19 = vshrl.u32 %v524_v18, 23  ;;  %v528_v44 = vand.u32 8388607, %v521_v29  ;;  %vm522_vm13 = vcmp.le.f32.partialorder %v521_v29, 0.7853982  ;;  %p850_p13 = pnand %p849_p12, %p1000_p4 }
  0x21   : > { %775 = vmatmul.mubr.msk.f32.vlgmr.msra.gmra.mxu0 %vm272_vm2, %v268_v12  ;;  %p857_p3 = por %p856_p2, %p855_p1 }
  0x22   : > { %v748_v20 = vadd.s32 4294967169, %v525_v19  ;;  %v529_v50 = vor.u32 8388608, %v528_v44  ;;  %p851_p0 = pneg %p850_p13 }
  0x24   : > { %v531_v21 = vadd.s32 1, %v748_v20  ;;  %v569_v56 = vshll.u32 %v529_v50, 8  ;;  %p858_p5 = pnand %p857_p3, %p851_p0 }
  0x26   : > { %vm532_vm5 = vcmp.gt.s32.totalorder %v531_v21, 0 }
  0x27   : > { %v533_v22 = vsel %vm532_vm5, %v531_v21, 0 }
  0x28   : > { %v535_v23 = vand.u32 31, %v533_v22  ;;  %v534_v30 = vshrl.u32 %v533_v22, 5 }
  0x2a   : > { %v536_v24 = vsub.s32 32, %v535_v23  ;;  %v547_v26 = vshll.u32 %v928_v25, %v535_v23  ;;  %v550_v31 = vshll.u32 %v929_v27, %v535_v23  ;;  %v538_v35 = vshll.u32 %v931_v34, %v535_v23 }
  0x2b   : > { %v541_v37 = vshll.u32 %v932_v36, %v535_v23  ;;  %v544_v41 = vshll.u32 %v933_v39, %v535_v23  ;;  %vm556_vm6 = vcmp.lt.s32.totalorder %v534_v30, 4  ;;  %vm553_vm7 = vcmp.lt.s32.totalorder %v534_v30, 1 }
  0x2c   : > { %v548_v28 = vshrl.u32 %v929_v27, %v536_v24  ;;  %v551_v33 = vshrl.u32 %v930_v32, %v536_v24  ;;  %v539_v38 = vshrl.u32 %v932_v36, %v536_v24  ;;  %v542_v40 = vshrl.u32 %v933_v39, %v536_v24 }
  0x2d   : > { %v545_v42 = vshrl.u32 %v928_v25, %v536_v24  ;;  %vm555_vm8 = vcmp.lt.s32.totalorder %v534_v30, 3  ;;  %vm554_vm9 = vcmp.lt.s32.totalorder %v534_v30, 2  ;;  %v537_v61 = vshrl.u32 %v931_v34, %v536_v24 }
  0x2e   : > { %v549_v43 = vor.u32 %v548_v28, %v547_v26  ;;  %v552_v45 = vor.u32 %v551_v33, %v550_v31  ;;  %v540_v46 = vor.u32 %v539_v38, %v538_v35  ;;  %v543_v47 = vor.u32 %v542_v40, %v541_v37 }
  0x2f   : > { %v546_v48 = vor.u32 %v545_v42, %v544_v41 }
  0x30   : > { %v562_v49 = vsel %vm556_vm6, %v549_v43, 920167782  ;;  %v566_v51 = vsel %vm556_vm6, %v552_v45, 1326507024  ;;  %v561_v52 = vsel %vm553_vm7, %v540_v46, %v543_v47  ;;  %v557_v1 = vsel %vm553_vm7, %v537_v61, %v540_v46 }
  0x31   : > { %v563_v53 = vsel %vm555_vm8, %v546_v48, %v562_v49  ;;  %v565_v54 = vsel %vm553_vm7, %v543_v47, %v546_v48  ;;  %v567_v55 = vsel %vm555_vm8, %v549_v43, %v566_v51  ;;  %v558_v0 = vsel %vm556_vm6, %v546_v48, 2102212464 }
  0x32   : > { %v564_v57 = vsel %vm554_vm9, %v561_v52, %v563_v53  ;;  %v568_v58 = vsel %vm554_vm9, %v565_v54, %v567_v55  ;;  %v559_v2 = vsel %vm555_vm8, %v543_v47, %v558_v0 }
  0x33   : > { %v1061_v59 = vmul.u32.u64.low %v569_v56, %v564_v57  ;;  %v1062_v60 = vmul.u32.u64.high %v569_v56, %v564_v57, %v1061_v59  ;;  %v1064_v62 = vmul.u32.u64.low %v569_v56, %v568_v58  ;;  %v1065_v63 = vmul.u32.u64.high %v569_v56, %v568_v58, %v1064_v62 }
  0x34   : > { %v560_v3 = vsel %vm554_vm9, %v557_v1, %v559_v2 }
  0x35   : > { %v579_v4 = vadd.s32 1, %v1062_v60  ;;  %vm578_vm10 = vc.u32 %v1065_v63, %v1061_v59  ;;  %v576_v5 = vmul.u32 %v569_v56, %v560_v3  ;;  %v577_v19 = vadd.s32 %v1061_v59, %v1065_v63 }
  0x37   : > { %v580_v6 = vsel %vm578_vm10, %v579_v4, %v1062_v60 }
  0x38   : > { %v581_v7 = vadd.s32 %v580_v6, %v576_v5 }
  0x3a   : > { %v582_v8 = vadd.s32 536870912, %v581_v7 }
  0x3c   : > { %v583_v9 = vshrl.u32 %v582_v8, 30 }
  0x3e   : > { %v584_v10 = vshll.u32 %v583_v9, 30  ;;  %v607_v34 = vsub.s32 4, %v583_v9 }
  0x40   : > { %v585_v11 = vsub.s32 %v581_v7, %v584_v10  ;;  %v608_v35 = vsel %vm523_vm12, %v607_v34, %v583_v9 }
  0x41   : > { %v610_v36 = vsel %vm522_vm13, 0, %v608_v35 }
  0x42   : > { %v587_v12 = vsub.s32 0, %v585_v11  ;;  %v614_v37 = vadd.s32 3, %v610_v36 }
  0x44   : > { %v749_v13 = vmin.u32 %v587_v12, %v585_v11  ;;  %v615_v40 = vand.u32 3, %v614_v37 }
  0x46   : > { %v589_v14 = vclz %v749_v13  ;;  %vm617_vm14 = vcmp.eq.s32.totalorder %v615_v40, 0  ;;  %vm620_vm15 = vcmp.eq.s32.totalorder %v615_v40, 2  ;;  %vm616_vm0 = vcmp.lt.s32.totalorder %v615_v40, 2 }
  0x48   : > { %v750_v15 = vadd.s32 4294967294, %v589_v14 }
  0x4a   : > { %vm751_vm11 = vcmp.lt.s32.totalorder %v750_v15, 0 }
  0x4b   : > { %v592_v16 = vsel %vm751_vm11, 0, %v750_v15 }
  0x4c   : > { %v597_v18 = vsub.s32 4294967266, %v592_v16  ;;  %v593_v20 = vsub.s32 32, %v592_v16  ;;  %v594_v22 = vshll.u32 %v585_v11, %v592_v16 }
  0x4e   : > { %v598_v21 = vadd.s32 127, %v597_v18  ;;  %v595_v23 = vshrl.u32 %v577_v19, %v593_v20 }
  0x50   : > { %v599_v24 = vshll.u32 %v598_v21, 23  ;;  %v596_v25 = vor.u32 %v595_v23, %v594_v22 }
  0x52   : > { %v600_v26 = vor.u32 4788187, %v599_v24  ;;  %v603_v28 = vcvt.s32.f32 %v596_v25 }
  0x54   : > { %v601_v27 = vand.u32 2147483647, %v600_v26 }
  0x56   : > { %v604_v30 = vmul.f32 %v603_v28, %v601_v27 }
  0x58   : > { %v605_v31 = vxor.u32 2147483648, %v604_v30 }
  0x5a   : > { %v606_v32 = vsel %vm523_vm12, %v605_v31, %v604_v30 }
  0x5b   : > { %v609_v33 = vsel %vm522_vm13, %v1047_v17, %v606_v32 }
  0x5c   : > { %844 = vcosq.f32 %v609_v33 }
  0x5d   : > { %846 = vsinq.f32 %v609_v33 }
  0x69   : > { %v845_v38 = vpop.eup %844 }
  0x6a   : > { %v847_v39 = vpop.eup %846  ;;  %v621_v42 = vxor.u32 2147483648, %v845_v38 }
  0x6b   : > { %v618_v41 = vxor.u32 2147483648, %v847_v39 }
  0x6c   : > { %v622_v44 = vsel %vm620_vm15, %v621_v42, %v847_v39 }
  0x6d   : > { %v619_v43 = vsel %vm617_vm14, %v845_v38, %v618_v41 }
  0x6e   : > { %v623_v47 = vsel %vm616_vm0, %v619_v43, %v622_v44 }
  0x6f   : > { %v624_v51 = vsel %vm613_vm1, nan, %v623_v47 }
  0xda   : > { %v422_v29 = vpop.f32.mrf.mxu1 }
  0xdc   : > { %v771_v45 = vpop.f32.mrf.mxu1 }
  0xdd   : > { %v346_v46 = vpop.f32.mrf.mxu0 }
  0xde   : > { %v423_v49 = vadd.f32 %v422_v29, %v346_v46 }
  0xdf   : > { %v766_v48 = vpop.f32.mrf.mxu0 }
  0xe1   : > { %v500_v50 = vpop.f32.mrf.mxu0 }
  0xe2   : > { %v504_v52 = vadd.f32 %v500_v50, %v423_v49 }
  0xe3   : > { %v776_v53 = vpop.f32.mrf.mxu0 }
  0xe4   : > { %v625_v54 = vadd.f32 %v624_v51, %v504_v52 }
  0xe6   : > { %626 = vst [vmem:[%s231_s9] sm:$0xff] %v625_v54 }
  0xe7   : > { %861 = shalt.err (!%p858_p5)
}
  0xe8   : > { %s862_s26 = scalar_lea.hbm %s640_s13, 128  ;;  %s866_s5 = scalar_lea.hbm %s1123_s4, 256 }
  0xe9   : > { %p863_p6 = scmp.ne.s32.totalorder %s640_s13, %s862_s26  ;;  %p867_p10 = scmp.lt.s32.totalorder %s640_s13, %s1123_s4 }
  0xea   : > { %p868_p11 = scmp.lt.s32.totalorder %s866_s5, %s862_s26 }
  0xeb   : > { %p864_p7 = pnand %p863_p6, %p1000_p4 }
  0xec   : > { %p869_p12 = por %p868_p11, %p867_p10 }
  0xed   : > { %p865_p9 = pneg %p864_p7 }
  0xef   : > { %p870_p13 = pnand %p869_p12, %p865_p9 }
  0xf1   : > { %873 = shalt.err (!%p870_p13)
}
  0xf2   : > { %781 = dma.vmem_to_hbm [thread:$0]  (%p1000_p4), %s643_s10, 128, %s640_s13, %s628_s14  }
  0xf3 PF: > { %p787_p0 = scmp.ge.s32.totalorder %s924_s20, 2  ;;  %s654_s8 = sand.u32 1, %s904_s15  }
  0xf4   : > { %s655_s9 = scalar_lea.sflag [#allocation3], %s654_s8 }
  0xf5   : > { %p784_p1 = pnand %p787_p0, %p1007_p8 }
  0xf7   : > { %p785_p2 = pneg %p784_p1 }
  0xf9   : > { %899 = dma.done.wait (%p785_p2), %s655_s9, 128  }
  0xfa   : > { %901 = vsyncadd (%p785_p2), %s655_s9, 4294967168  ;;  %s17_s20 = sadd.s32 1, %s924_s20   ;;  %s1126_s15 = smov %s908_s16 }
  0xfb   : > { %p14_p3 = scmp.ge.s32.totalorder %s17_s20, 4   ;;  %s1127_s16 = smov %s912_s17 }
  0xfc   : > { %s1128_s17 = smov %s1013_s28  ;;  %s1129_s18 = smov %s920_s19 }
  0xfd   : > { %s1130_s19 = smov %s1132_s23  ;;  %16 = sbr.rel (!%p14_p3) target bundleno = 4 (0x4), region = 76 }
 0x102   :  { %660 = vsyncpa [#allocation3], 1 }
 0x103   :  { %662 = vsyncpa [#allocation3 + $0x1], 1 }

</bundles_post_ra>
